<compile_context>
chip_gen: v6e
topology: v6e:2x2x1
jax: 0.10.0
libtpu: 0.0.40
codegen_flags: <defaults>
</compile_context>

<pallas_src>
import functools

import jax
import jax.numpy as jnp
from jax.experimental import pallas as pl
from jax.experimental.pallas import tpu as pltpu


# ----------------------------------------------------------------------------
# torch-semantics shape computation (exactly mirrors OnnxSqueeze.forward)
# ----------------------------------------------------------------------------
def _squeeze_output_shape(shape, axes):
    shape = list(shape)
    if axes is None:
        # torch.squeeze(x): drop every size-1 dim
        return tuple(d for d in shape if d != 1)
    # axes, _ = torch.sort(axes); then squeeze one dim at a time (pop+shift)
    axes = sorted(int(a) for a in axes)
    for a in axes:
        nd = len(shape)
        d = a + nd if a < 0 else a
        if d < 0 or d >= nd:
            raise ValueError(f"squeeze dim {a} out of range for ndim {nd}")
        # torch.squeeze(x, dim=d): only removes the dim if it is size 1
        if shape[d] == 1:
            shape.pop(d)
    return tuple(shape)


def _round_up(x, m):
    return ((x + m - 1) // m) * m


# ~2 MiB per block.  Input + output each double-buffered -> ~8 MiB of VMEM,
# inside the default scoped limit on every generation (v5e 16 MiB, v6e/v7x
# 32 MiB) and far under v7x's 64 MiB physical VMEM.
_TARGET_BLOCK_BYTES = 2 * 1024 * 1024


def _choose_tiling(total, itemsize):
    """Pick a lane-dense 2-D factorization and block shape for a flat copy.

    Returns (rows, cols, block_rows, block_cols).
    """
    target_elems = max(_TARGET_BLOCK_BYTES // itemsize, 128)
    base = {4: 8, 2: 16, 1: 32}.get(itemsize, 8)  # sublane packing per dtype

    # Preferred: cols = largest multiple of 128 (capped at 2048) dividing the
    # total element count -> fully lane-dense, unmasked vector loads/stores,
    # 1-D grid over rows with full-width blocks.
    for c in range(2048, 127, -128):
        if total % c == 0:
            cols = c
            rows = total // cols
            rows_per_block = max(base, (target_elems // cols) // base * base)
            block_rows = min(rows_per_block, _round_up(rows, base))
            return rows, cols, block_rows, cols

    # Fallback (no multiple-of-128 factor): single lane-major row, tiled along
    # lanes; the ragged last block is handled by Pallas write masking.
    if total <= target_elems:
        return 1, total, 1, total  # one block == full dims (any size allowed)
    block_cols = (target_elems // 128) * 128
    return 1, total, 1, block_cols


# ----------------------------------------------------------------------------
# Pallas copy kernel
# ----------------------------------------------------------------------------
def _copy_kernel(x_ref, o_ref):
    o_ref[...] = x_ref[...]


@functools.partial(
    jax.jit,
    static_argnames=("rows", "cols", "block_rows", "block_cols", "out_shape"),
)
def _squeeze_copy(x, *, rows, cols, block_rows, block_cols, out_shape):
    x2d = x.reshape(rows, cols)

    if block_cols == cols:
        # Lane-dense path: tile along rows, full-width (multiple-of-128) cols.
        grid = (pl.cdiv(rows, block_rows),)
        in_spec = pl.BlockSpec((block_rows, cols), lambda i: (i, 0))
        out_spec = pl.BlockSpec((block_rows, cols), lambda i: (i, 0))
    else:
        # Flat fallback: one row, tile along lanes (ragged tail is masked).
        grid = (pl.cdiv(cols, block_cols),)
        in_spec = pl.BlockSpec((block_rows, block_cols), lambda i: (0, i))
        out_spec = pl.BlockSpec((block_rows, block_cols), lambda i: (0, i))

    y2d = pl.pallas_call(
        _copy_kernel,
        out_shape=jax.ShapeDtypeStruct((rows, cols), x.dtype),
        grid=grid,
        in_specs=[in_spec],
        out_specs=out_spec,
        compiler_params=pltpu.CompilerParams(
            dimension_semantics=("parallel",),
            vmem_limit_bytes=32 * 1024 * 1024,
        ),
    )(x2d)
    return y2d.reshape(out_shape)


# ----------------------------------------------------------------------------
# OnnxSqueeze.forward equivalent
# ----------------------------------------------------------------------------
def onnx_squeeze(input_tensor, axes=None, static_axes=None):
    """Equivalent of OnnxSqueeze(axes=static_axes)(input_tensor, axes)."""
    # TODO(synk): traced (data-dependent) `axes` tensors are unsupported —
    # output shapes must be static in JAX, so axes must be concrete here.
    axes = axes if axes is not None else static_axes
    out_shape = _squeeze_output_shape(input_tensor.shape, axes)

    total = 1
    for d in input_tensor.shape:
        total *= d
    if total == 0:
        # Nothing to move; squeeze is purely a metadata change.
        return jnp.reshape(input_tensor, out_shape)

    itemsize = jnp.dtype(input_tensor.dtype).itemsize
    rows, cols, block_rows, block_cols = _choose_tiling(total, itemsize)
    return _squeeze_copy(
        input_tensor,
        rows=rows,
        cols=cols,
        block_rows=block_rows,
        block_cols=block_cols,
        out_shape=out_shape,
    )


# ----------------------------------------------------------------------------
# Demo / self-check
# ----------------------------------------------------------------------------
if __name__ == "__main__":
    key = jax.random.PRNGKey(0)
    k1, k2, k3, k4, k5 = jax.random.split(key, 5)

    # Case 1: explicit axes (including a negative axis), like ONNX Squeeze.
    x1 = jax.random.normal(k1, (2, 1, 4, 16, 1), dtype=jnp.float32)
    y1_ref = x1.reshape(2, 4, 16)
    y1 = jax.block_until_ready(onnx_squeeze(x1, static_axes=[1, -1]))
    assert y1.shape == (2, 4, 16), y1.shape
    assert jnp.array_equal(y1, y1_ref)

    # Case 2: axes=None -> squeeze all size-1 dims.
    x2 = jax.random.normal(k2, (1, 2, 1, 4, 16), dtype=jnp.float32)
    y2_ref = x2.reshape(2, 4, 16)
    y2 = jax.block_until_ready(onnx_squeeze(x2, static_axes=None))
    assert y2.shape == (2, 4, 16), y2.shape
    assert jnp.array_equal(y2, y2_ref)

    # Case 3: lane-dense path (total divisible by a multiple of 128).
    x3 = jax.random.normal(k3, (2, 1, 32, 128), dtype=jnp.float32)
    y3_ref = x3.reshape(2, 32, 128)
    y3 = jax.block_until_ready(onnx_squeeze(x3, static_axes=[1]))
    assert y3.shape == (2, 32, 128), y3.shape
    assert jnp.array_equal(y3, y3_ref)

    # Case 4: bf16 fallback path (element count not a multiple of 128).
    x4 = jax.random.normal(k4, (3, 1, 5, 7), dtype=jnp.bfloat16)
    y4_ref = x4.reshape(3, 5, 7)
    y4 = jax.block_until_ready(onnx_squeeze(x4, static_axes=[1]))
    assert y4.shape == (3, 5, 7), y4.shape
    assert jnp.array_equal(y4, y4_ref)

    # Case 5: larger slab exercising a multi-block row grid (2 MiB tiles).
    x5 = jax.random.normal(k5, (4, 1, 512, 512), dtype=jnp.float32)
    y5_ref = x5.reshape(4, 512, 512)
    y5 = jax.block_until_ready(onnx_squeeze(x5, static_axes=[1]))
    assert y5.shape == (4, 512, 512), y5.shape
    assert jnp.array_equal(y5, y5_ref)

    print("KERNEL_OK")
</pallas_src>

<mosaic_0001>
module attributes {stable_mosaic.version = 11 : i64} {
  func.func @_copy_kernel(%arg0: i32, %arg1: memref<8x128xf32, #tpu.memory_space<vmem>>, %arg2: memref<8x128xf32, #tpu.memory_space<vmem>>) attributes {dimension_semantics = [#tpu.dimension_semantics<parallel>], iteration_bounds = array<i64: 1>, scalar_prefetch = 0 : i64, scratch_operands = 0 : i64, tpu.core_type = #tpu.core_type<tc>, window_params = [{transform_indices = @transform_0, window_bounds = array<i64: 8, 128>}, {transform_indices = @transform_1, window_bounds = array<i64: 8, 128>}]} {
    %c0 = arith.constant 0 : index
    %c0_0 = arith.constant 0 : index
    %0 = vector.load %arg1[%c0, %c0_0] : memref<8x128xf32, #tpu.memory_space<vmem>>, vector<8x128xf32>
    %c0_1 = arith.constant 0 : index
    %c0_2 = arith.constant 0 : index
    %1 = vector.load %arg2[%c0_1, %c0_2] : memref<8x128xf32, #tpu.memory_space<vmem>>, vector<8x128xf32>
    tpu.vector_store %arg2[%c0_1, %c0_2], %0 {strides = array<i32>} : memref<8x128xf32, #tpu.memory_space<vmem>>, vector<8x128xf32>,
    return
  }
  func.func @transform_0(%arg0: i32) -> (i32, i32) {
    %c0_i32 = arith.constant 0 : i32
    %c0_i32_0 = arith.constant 0 : i32
    return %arg0, %c0_i32 : i32, i32
  }
  func.func @transform_1(%arg0: i32) -> (i32, i32) {
    %c0_i32 = arith.constant 0 : i32
    %c0_i32_0 = arith.constant 0 : i32
    return %arg0, %c0_i32 : i32, i32
  }
}

</mosaic_0001>

<bundles_post_ra>
// kernel: _squeeze_copy.1
= control target key start
LH: loop header
LB: loop body
LE: loop exit
PB: predicated region body
PF: predicated region fallthrough
CT: control target
= control target key end

     0   :  { %s67_s0 = inlined_call_operand.vmem [shape: f32[1,128], index: 0, kind: input, shape index: {}]   ;;  %s68_s1 = inlined_call_operand.vmem [shape: f32[1,128], index: 1, kind: output, shape index: {}]  }
   0x1   :  { %v8_v0 = vld [vmem:[%s67_s0] sm:$0xff] }
   0x2   :  { %9 = vst [vmem:[#allocation2] sm:$0xff] %v8_v0 }
   0x9   :  { %v28_v1 = vld [vmem:[#allocation2] sm:$0x1] }
   0xa   :  { %29 = vst [vmem:[%s68_s1] sm:$0x1] %v28_v1 }

</bundles_post_ra>
